<compile_context>
chip_gen: v5e
topology: v5e:2x2
jax: 0.10.0
libtpu: 0.0.40
codegen_flags: <defaults>
</compile_context>

<pallas_src>
import functools

import jax
import jax.numpy as jnp
from jax.experimental import pallas as pl
from jax.experimental.pallas import tpu as pltpu

_LANES = 128           # vreg lane width
_MAX_TILE_ROWS = 2048  # 2048*128*4B = 1 MiB per input block


def _dice_loss_kernel(pr_ref, gt_ref, o_ref, inter_acc, union_acc, *,
                      n_elems, smooth):
    step = pl.program_id(0)

    @pl.when(step == 0)
    def _init():
        inter_acc[...] = jnp.zeros_like(inter_acc)
        union_acc[...] = jnp.zeros_like(union_acc)

    # Pure VPU per step: element-wise accumulate (no reduction yet).
    pr = pr_ref[...].astype(jnp.float32)
    gt = gt_ref[...].astype(jnp.float32)
    inter_acc[...] += pr * gt
    union_acc[...] += pr + gt

    @pl.when(step == pl.num_programs(0) - 1)
    def _finalize():
        inter = jnp.sum(inter_acc[...])   # sum(pr * gt)   (zero-padding adds 0)
        union = jnp.sum(union_acc[...])   # sum(pr + gt)   (zero-padding adds 0)

        # dice(pr, gt)
        dice_pg = (smooth + 2.0 * inter) / (smooth + union)

        # dice(1-pr, 1-gt), computed analytically over the TRUE N elements:
        #   sum((1-p)*(1-g)) = N - sum(p) - sum(g) + sum(p*g) = N - union + inter
        #   sum((1-p)+(1-g)) = 2N - union
        inter_c = n_elems - union + inter
        union_c = 2.0 * n_elems - union
        dice_c = (smooth + 2.0 * inter_c) / (smooth + union_c)

        o_ref[0, 0] = (2.0 - dice_pg - dice_c).astype(o_ref.dtype)


def _round_up(x, m):
    return ((x + m - 1) // m) * m


def dice_loss(pr, gt, smooth=1.0):
    """Pallas TPU DiceLoss. pr/gt: same-shape arrays. Returns scalar f32."""
    assert pr.shape == gt.shape, "pr and gt must have the same shape"
    n = int(pr.size)  # true element count (static)

    pr_flat = pr.reshape(-1)
    gt_flat = gt.reshape(-1)

    # Choose a lane-dense tile: (tile_rows, 128) with tile_rows a multiple of 8,
    # capped so the double-buffered inputs + scratch stay tiny in VMEM.
    rows_needed = _round_up(max(-(-n // _LANES), 8), 8)
    tile_rows = min(_MAX_TILE_ROWS, rows_needed)
    block_elems = tile_rows * _LANES

    padded = _round_up(n, block_elems)
    if padded != n:
        # Zero padding is exact: contributes 0 to both running sums.
        pr_flat = jnp.pad(pr_flat, (0, padded - n))
        gt_flat = jnp.pad(gt_flat, (0, padded - n))

    rows = padded // _LANES
    pr2 = pr_flat.reshape(rows, _LANES)
    gt2 = gt_flat.reshape(rows, _LANES)
    grid = (rows // tile_rows,)

    kernel = functools.partial(_dice_loss_kernel,
                               n_elems=float(n), smooth=float(smooth))

    out = pl.pallas_call(
        kernel,
        out_shape=jax.ShapeDtypeStruct((1, 1), jnp.float32),
        grid_spec=pltpu.PrefetchScalarGridSpec(
            num_scalar_prefetch=0,
            grid=grid,
            in_specs=[
                pl.BlockSpec((tile_rows, _LANES), lambda i: (i, 0)),
                pl.BlockSpec((tile_rows, _LANES), lambda i: (i, 0)),
            ],
            out_specs=pl.BlockSpec(memory_space=pltpu.MemorySpace.SMEM),
            scratch_shapes=[
                pltpu.VMEM((tile_rows, _LANES), jnp.float32),  # inter accumulator
                pltpu.VMEM((tile_rows, _LANES), jnp.float32),  # union accumulator
            ],
        ),
        compiler_params=pltpu.CompilerParams(
            # Single reduction axis with a shared accumulator -> "arbitrary".
            dimension_semantics=("arbitrary",),
        ),
    )(pr2, gt2)
    return out[0, 0]


def dice_loss_ref(pr, gt, smooth=1.0):
    """Plain-JAX reference mirroring the PyTorch module exactly."""
    def dice(p, g):
        p = p.reshape(-1)
        g = g.reshape(-1)
        inter = jnp.sum(p * g)
        union = jnp.sum(p + g)
        return (smooth + 2.0 * inter) / (smooth + union)
    return 2.0 - dice(pr, gt) - dice(1.0 - pr, 1.0 - gt)


if __name__ == "__main__":
    key = jax.random.PRNGKey(0)
    kp, kg = jax.random.split(key)

    shape = (2, 4, 16, 16)  # [batch, channels, H, W] segmentation maps
    pr = jax.random.uniform(kp, shape, jnp.float32)                       # predictions in [0, 1]
    gt = (jax.random.uniform(kg, shape, jnp.float32) > 0.5).astype(jnp.float32)  # binary ground truth

    out = dice_loss(pr, gt)
    out = jax.block_until_ready(out)

    ref = dice_loss_ref(pr, gt)
    assert out.shape == ()
    assert jnp.allclose(out, ref, atol=1e-5, rtol=1e-5), (out, ref)

    print("KERNEL_OK")
</pallas_src>

<mosaic_0001>
module attributes {stable_mosaic.version = 11 : i64} {
  func.func @_dice_loss_kernel(%arg0: i32, %arg1: memref<16x128xf32, #tpu.memory_space<vmem>>, %arg2: memref<16x128xf32, #tpu.memory_space<vmem>>, %arg3: memref<1x1xf32, #tpu.memory_space<smem>>, %arg4: memref<16x128xf32, #tpu.memory_space<vmem>>, %arg5: memref<16x128xf32, #tpu.memory_space<vmem>>) attributes {dimension_semantics = [#tpu.dimension_semantics<arbitrary>], iteration_bounds = array<i64: 1>, scalar_prefetch = 0 : i64, scratch_operands = 2 : i64, tpu.core_type = #tpu.core_type<tc>, window_params = [{transform_indices = @transform_0, window_bounds = array<i64: 16, 128>}, {transform_indices = @transform_1, window_bounds = array<i64: 16, 128>}, {transform_indices = @transform_2, window_bounds = array<i64: 1, 1>}]} {
    %c0_i32 = arith.constant 0 : i32
    %0 = arith.cmpi eq, %arg0, %c0_i32 : i32
    %1 = arith.extui %0 : i1 to i32
    %c0_i32_0 = arith.constant 0 : i32
    %2 = arith.cmpi ne, %1, %c0_i32_0 : i32
    scf.if %2 {
      %cst = arith.constant 0.000000e+00 : f32
      %16 = vector.broadcast %cst : f32 to vector<16x128xf32>
      %c0_14 = arith.constant 0 : index
      %c0_15 = arith.constant 0 : index
      %17 = vector.load %arg4[%c0_14, %c0_15] : memref<16x128xf32, #tpu.memory_space<vmem>>, vector<16x128xf32>
      tpu.vector_store %arg4[%c0_14, %c0_15], %16 {strides = array<i32>} : memref<16x128xf32, #tpu.memory_space<vmem>>, vector<16x128xf32>,
      %cst_16 = arith.constant 0.000000e+00 : f32
      %18 = vector.broadcast %cst_16 : f32 to vector<16x128xf32>
      %c0_17 = arith.constant 0 : index
      %c0_18 = arith.constant 0 : index
      %19 = vector.load %arg5[%c0_17, %c0_18] : memref<16x128xf32, #tpu.memory_space<vmem>>, vector<16x128xf32>
      tpu.vector_store %arg5[%c0_17, %c0_18], %18 {strides = array<i32>} : memref<16x128xf32, #tpu.memory_space<vmem>>, vector<16x128xf32>,
    } else {
    }
    %c0 = arith.constant 0 : index
    %c0_1 = arith.constant 0 : index
    %3 = vector.load %arg1[%c0, %c0_1] : memref<16x128xf32, #tpu.memory_space<vmem>>, vector<16x128xf32>
    %c0_2 = arith.constant 0 : index
    %c0_3 = arith.constant 0 : index
    %4 = vector.load %arg2[%c0_2, %c0_3] : memref<16x128xf32, #tpu.memory_space<vmem>>, vector<16x128xf32>
    %c0_4 = arith.constant 0 : index
    %c0_5 = arith.constant 0 : index
    %5 = vector.load %arg4[%c0_4, %c0_5] : memref<16x128xf32, #tpu.memory_space<vmem>>, vector<16x128xf32>
    %6 = arith.mulf %3, %4 : vector<16x128xf32>
    %7 = arith.addf %5, %6 : vector<16x128xf32>
    %c0_6 = arith.constant 0 : index
    %c0_7 = arith.constant 0 : index
    %8 = vector.load %arg4[%c0_6, %c0_7] : memref<16x128xf32, #tpu.memory_space<vmem>>, vector<16x128xf32>
    tpu.vector_store %arg4[%c0_6, %c0_7], %7 {strides = array<i32>} : memref<16x128xf32, #tpu.memory_space<vmem>>, vector<16x128xf32>,
    %c0_8 = arith.constant 0 : index
    %c0_9 = arith.constant 0 : index
    %9 = vector.load %arg5[%c0_8, %c0_9] : memref<16x128xf32, #tpu.memory_space<vmem>>, vector<16x128xf32>
    %10 = arith.addf %3, %4 : vector<16x128xf32>
    %11 = arith.addf %9, %10 : vector<16x128xf32>
    %c0_10 = arith.constant 0 : index
    %c0_11 = arith.constant 0 : index
    %12 = vector.load %arg5[%c0_10, %c0_11] : memref<16x128xf32, #tpu.memory_space<vmem>>, vector<16x128xf32>
    tpu.vector_store %arg5[%c0_10, %c0_11], %11 {strides = array<i32>} : memref<16x128xf32, #tpu.memory_space<vmem>>, vector<16x128xf32>,
    %c0_i32_12 = arith.constant 0 : i32
    %13 = arith.cmpi eq, %arg0, %c0_i32_12 : i32
    %14 = arith.extui %13 : i1 to i32
    %c0_i32_13 = arith.constant 0 : i32
    %15 = arith.cmpi ne, %14, %c0_i32_13 : i32
    scf.if %15 {
      %c0_14 = arith.constant 0 : index
      %c0_15 = arith.constant 0 : index
      %16 = vector.load %arg4[%c0_14, %c0_15] : memref<16x128xf32, #tpu.memory_space<vmem>>, vector<16x128xf32>
      %17 = vector.shape_cast %16 : vector<16x128xf32> to vector<1x16x128xf32>
      %cst = arith.constant dense<0.000000e+00> : vector<1xf32>
      %18 = vector.multi_reduction <add>, %17, %cst [1, 2] : vector<1x16x128xf32> to vector<1xf32>
      %19 = vector.shape_cast %18 : vector<1xf32> to vector<1x1x1xf32>
      %20 = vector.extract %19[0, 0, 0] : f32 from vector<1x1x1xf32>
      %c0_16 = arith.constant 0 : index
      %c0_17 = arith.constant 0 : index
      %21 = vector.load %arg5[%c0_16, %c0_17] : memref<16x128xf32, #tpu.memory_space<vmem>>, vector<16x128xf32>
      %22 = vector.shape_cast %21 : vector<16x128xf32> to vector<1x16x128xf32>
      %cst_18 = arith.constant dense<0.000000e+00> : vector<1xf32>
      %23 = vector.multi_reduction <add>, %22, %cst_18 [1, 2] : vector<1x16x128xf32> to vector<1xf32>
      %24 = vector.shape_cast %23 : vector<1xf32> to vector<1x1x1xf32>
      %25 = vector.extract %24[0, 0, 0] : f32 from vector<1x1x1xf32>
      %cst_19 = arith.constant 2.000000e+00 : f32
      %26 = arith.mulf %cst_19, %20 : f32
      %cst_20 = arith.constant 1.000000e+00 : f32
      %27 = arith.addf %cst_20, %26 : f32
      %cst_21 = arith.constant 1.000000e+00 : f32
      %28 = arith.addf %cst_21, %25 : f32
      %29 = arith.divf %27, %28 : f32
      %cst_22 = arith.constant 2.048000e+03 : f32
      %30 = arith.subf %cst_22, %25 : f32
      %31 = arith.addf %30, %20 : f32
      %cst_23 = arith.constant 4.096000e+03 : f32
      %32 = arith.subf %cst_23, %25 : f32
      %cst_24 = arith.constant 2.000000e+00 : f32
      %33 = arith.mulf %cst_24, %31 : f32
      %cst_25 = arith.constant 1.000000e+00 : f32
      %34 = arith.addf %cst_25, %33 : f32
      %cst_26 = arith.constant 1.000000e+00 : f32
      %35 = arith.addf %cst_26, %32 : f32
      %36 = arith.divf %34, %35 : f32
      %cst_27 = arith.constant 2.000000e+00 : f32
      %37 = arith.subf %cst_27, %29 : f32
      %38 = arith.subf %37, %36 : f32
      %c0_28 = arith.constant 0 : index
      %c0_29 = arith.constant 0 : index
      %39 = memref.load %arg3[%c0_28, %c0_29] : memref<1x1xf32, #tpu.memory_space<smem>>
      memref.store %38, %arg3[%c0_28, %c0_29] : memref<1x1xf32, #tpu.memory_space<smem>>
    } else {
    }
    return
  }
  func.func @transform_0(%arg0: i32) -> (i32, i32) {
    %c0_i32 = arith.constant 0 : i32
    %c0_i32_0 = arith.constant 0 : i32
    return %arg0, %c0_i32 : i32, i32
  }
  func.func @transform_1(%arg0: i32) -> (i32, i32) {
    %c0_i32 = arith.constant 0 : i32
    %c0_i32_0 = arith.constant 0 : i32
    return %arg0, %c0_i32 : i32, i32
  }
  func.func @transform_2(%arg0: i32) -> (i32, i32) {
    %c0_i32 = arith.constant 0 : i32
    %c0_i32_0 = arith.constant 0 : i32
    %c0_i32_1 = arith.constant 0 : i32
    return %c0_i32, %c0_i32_0 : i32, i32
  }
}

</mosaic_0001>

<bundles_post_ra>
// kernel: tpu_custom_call.1
= control target key start
LH: loop header
LB: loop body
LE: loop exit
PB: predicated region body
PF: predicated region fallthrough
CT: control target
= control target key end

     0   :  { %7 = vsyncpa [#allocation5], 0  ;;  %s284_s0 = inlined_call_operand.hbm [shape: f32[16,128], index: 0, kind: input, shape index: {}]   ;;  %s285_s1 = inlined_call_operand.hbm [shape: f32[16,128], index: 1, kind: input, shape index: {}]   ;;  %s286_s2 = inlined_call_operand.hbm [shape: f32[1,1], index: 2, kind: output, shape index: {}]  }
   0x1   :  { %8 = vsyncpa [#allocation8], 0 }
   0x2   :  { %9 = vsyncpa [#allocation6], 0  ;;  %s14_s11 = sshll.u32 %s284_s0, 4  ;;  %s246_s12 = smov [#allocation4]   ;;  %s15_s11 = int_to_ptr.hbm [resolvable:$true] %s14_s11 }
   0x3   :  { %s16_s13 = sshll.u32 %s246_s12, 4  ;;  %s27_s16 = sshll.u32 %s285_s1, 4  ;;  %s17_s13 = int_to_ptr.vmem [resolvable:$true] %s16_s13  ;;  %s28_s16 = int_to_ptr.hbm [resolvable:$true] %s27_s16 }
   0x4   :  { %s247_s17 = smov 128   ;;  %s248_s18 = smov 8  }
   0x5   :  { %22 = dma.hbm_to_vmem [thread:$0]  %s15_s11, 256, %s17_s13, [#allocation5], %s247_s17, %s247_s17, %s248_s18  }
   0x6   :  { %s249_s19 = smov [#allocation7]  }
   0x7   :  { %s29_s20 = sshll.u32 %s249_s19, 4  ;;  %s30_s20 = int_to_ptr.vmem [resolvable:$true] %s29_s20 }
   0x8   :  { %35 = dma.hbm_to_vmem [thread:$0]  %s28_s16, 256, %s30_s20, [#allocation8], %s247_s17, %s247_s17, %s248_s18  }
   0x9   :  { %240 = dma.done.wait [#allocation5], 256  }
   0xa   :  { %241 = vsyncadd [#allocation5], 4294967040 }
   0xb   :  { %242 = dma.done.wait [#allocation8], 256  }
   0xc   :  { %243 = vsyncadd [#allocation8], 4294967040  ;;  %v52_v0 = vld [vmem:[#allocation4] sm:$0xff]  ;;  %v53_v1 = vld [vmem:[#allocation4 + $0x8] sm:$0xff]  ;;  %s151_s7 = sshll.u32 %s286_s2, 4  ;;  %s250_s11 = smov [#allocation9]   ;;  %s152_s7 = int_to_ptr.hbm [resolvable:$true] %s151_s7 }
   0xd   :  { %v54_v2 = vld [vmem:[#allocation7] sm:$0xff]  ;;  %v55_v3 = vld [vmem:[#allocation7 + $0x8] sm:$0xff] }
   0xe   :  { %v58_v4 = vmul.f32 %v54_v2, %v52_v0  ;;  %v59_v5 = vmul.f32 %v55_v3, %v53_v1  ;;  %v66_v7 = vadd.f32 %v54_v2, %v52_v0  ;;  %v67_v8 = vadd.f32 %v55_v3, %v53_v1 }
  0x10   :  { %v77_v6 = vadd.f32 %v59_v5, %v58_v4  ;;  %v89_v9 = vadd.f32 %v67_v8, %v66_v7 }
  0x12   :  { %78 = vadd.xlane.f32.xlu0 %v77_v6 }
  0x1a   :  { %90 = vadd.xlane.f32.xlu0 %v89_v9 }
  0x85   :  { %v79_v10 = vpop.xlane.xlu0 %78 }
  0x86   :  { %v80_v11 = vrot.slane %v79_v10, 4 }
  0x88   :  { %v81_v12 = vadd.f32 %v80_v11, %v79_v10 }
  0x8a   :  { %v82_v13 = vrot.slane %v81_v12, 2 }
  0x8c   :  { %v83_v14 = vadd.f32 %v82_v13, %v81_v12 }
  0x8d   :  { %v91_v15 = vpop.xlane.xlu0 %90 }
  0x8e   :  { %v92_v16 = vrot.slane %v91_v15, 4  ;;  %v84_v17 = vrot.slane %v83_v14, 1 }
  0x90   :  { %v93_v18 = vadd.f32 %v92_v16, %v91_v15  ;;  %v85_v19 = vadd.f32 %v84_v17, %v83_v14 }
  0x92   :  { %v94_v20 = vrot.slane %v93_v18, 2  ;;  %163 = vpush %v85_v19 }
  0x94   :  { %v95_v21 = vadd.f32 %v94_v20, %v93_v18 }
  0x96   :  { %v96_v22 = vrot.slane %v95_v21, 1 }
  0x98   :  { %v97_v23 = vadd.f32 %v96_v22, %v95_v21 }
  0x9a   :  { %165 = vpush %v97_v23 }
  0xc3   :  { %s272_s0 = spop %163 }
  0xc4   :  { %s99_s26 = smul.f32 2.0, %s272_s0 }
  0xc6   :  { %s100_s28 = sadd.f32 1.0, %s99_s26 }
  0xcb   :  { %s274_s1 = spop %165 }
  0xcc   :  { %s101_s21 = sadd.f32 1.0, %s274_s1 }
  0xcd   :  { %s121_s22 = ssub.f32 4096.0, %s274_s1 }
  0xce   :  { %v102_v24 = vstv %s101_s21  ;;  %s119_s24 = ssub.f32 2048.0, %s274_s1 }
  0xcf   :  { %176 = vrcp.f32 %v102_v24  ;;  %s124_s23 = sadd.f32 1.0, %s121_s22  ;;  %v112_v30 = vand.u32 2147483647, %v102_v24  ;;  %v114_v31 = vand.u32 2147483648, %v102_v24  ;;  %vm108_vm1 = vweird.f32 %v102_v24 }
  0xd0   :  { %s120_s25 = sadd.f32 %s272_s0, %s119_s24 }
  0xd1   :  { %v125_v25 = vstv %s124_s23  ;;  %vm113_vm3 = vcmp.eq.f32.partialorder %v112_v30, 8.507059e+37  ;;  %v115_v36 = vor.u32 1.1754944e-38, %v114_v31 }
  0xd2   :  { %178 = vrcp.f32 %v125_v25  ;;  %v137_v37 = vand.u32 2147483648, %v125_v25  ;;  %v135_v40 = vand.u32 2147483647, %v125_v25  ;;  %vm131_vm5 = vweird.f32 %v125_v25  ;;  %s122_s27 = smul.f32 2.0, %s120_s25 }
  0xd4   :  { %v138_v43 = vor.u32 1.1754944e-38, %v137_v37  ;;  %vm136_vm7 = vcmp.eq.f32.partialorder %v135_v40, 8.507059e+37  ;;  %s123_s3 = sadd.f32 1.0, %s122_s27 }
  0xd5   :  { %v177_v26 = vpop.eup %176 }
  0xd6   :  { %v104_v27 = vmul.f32 %v177_v26, %v102_v24  ;;  %vm109_vm0 = vweird.f32 %v177_v26 }
  0xd7   :  { %vm110_vm2 = vmor %vm108_vm1, %vm109_vm0 }
  0xd8   :  { %v105_v28 = vsub.f32 1.0, %v104_v27  ;;  %v179_v29 = vpop.eup %178 }
  0xd9   :  { %v127_v32 = vmul.f32 %v179_v29, %v125_v25  ;;  %vm132_vm4 = vweird.f32 %v179_v29 }
  0xda   :  { %v106_v33 = vmul.f32 %v177_v26, %v105_v28  ;;  %vm133_vm6 = vmor %vm131_vm5, %vm132_vm4 }
  0xdb   :  { %v128_v35 = vsub.f32 1.0, %v127_v32 }
  0xdc   :  { %v107_v34 = vadd.f32 %v177_v26, %v106_v33 }
  0xdd   :  { %v129_v39 = vmul.f32 %v179_v29, %v128_v35 }
  0xde   :  { %v111_v38 = vsel %vm110_vm2, %v177_v26, %v107_v34 }
  0xdf   :  { %v116_v41 = vsel %vm113_vm3, %v115_v36, %v111_v38  ;;  %v130_v42 = vadd.f32 %v179_v29, %v129_v39 }
  0xe0   :  { %167 = vpush %v116_v41 }
  0xe1   :  { %v134_v44 = vsel %vm133_vm6, %v179_v29, %v130_v42 }
  0xe2   :  { %v139_v45 = vsel %vm136_vm7, %v138_v43, %v134_v44 }
  0xe3   :  { %169 = vpush %v139_v45 }
 0x111   :  { %s168_s29 = spop %167 }
 0x112   :  { %s118_s30 = smul.f32 %s168_s29, %s100_s28 }
 0x114   :  { %s142_s4 = ssub.f32 2.0, %s118_s30  ;;  %s170_s8 = spop %169 }
 0x115   :  { %s141_s9 = smul.f32 %s170_s8, %s123_s3 }
 0x117   :  { %s143_s10 = ssub.f32 %s142_s4, %s141_s9 }
 0x119   :  { %145 = sst [smem:[#allocation9]] %s143_s10 }
 0x11a   :  { %154 = dma.smem_to_hbm %s250_s11, 16, %s152_s7, [#allocation6]  }
 0x11b   :  { %244 = dma.done.wait [#allocation6], 16  }
 0x11c   :  { %245 = vsyncadd [#allocation6], 4294967280 }
 0x11d   :  { %159 = sfence }
 0x11e   :  { %160 = vsyncpa [#allocation5], 1 }
 0x11f   :  { %161 = vsyncpa [#allocation8], 1 }
 0x120   :  { %162 = vsyncpa [#allocation6], 1 }

</bundles_post_ra>
